<compile_context>
chip_gen: v7x
topology: tpu7x:2x2x1
jax: 0.10.0
libtpu: 0.0.40
codegen_flags: <defaults>
</compile_context>

<pallas_src>
import numpy as np
import jax
import jax.numpy as jnp
from jax import lax
from jax.experimental import pallas as pl
from jax.experimental.pallas import tpu as pltpu

# type constants from the original file
DO_TYPE = 1
D_TYPE = 1
K_TYPE = 3
Q_TYPE = 2
U_TYPE = 0
UT_TYPE = 0

EPS = 1e-12

# Matmul operand dtype.  TODO(synk): set to jnp.bfloat16 on v6e/v7x at
# production sizes (native MXU throughput, half the weight/activation bytes;
# accumulation stays f32 via preferred_element_type).  Kept f32 here so the
# toy-shape run matches the f32 reference within rtol/atol 1e-3.
MXU_DTYPE = jnp.float32


def _mm(a, b):
    return jnp.dot(a.astype(MXU_DTYPE), b.astype(MXU_DTYPE),
                   preferred_element_type=jnp.float32)


def _l2n_kernel(x):
    # F.normalize(dim=-1): x / max(||x||, eps) == x * rsqrt(max(||x||^2, eps^2))
    return x * lax.rsqrt(jnp.maximum(jnp.sum(x * x, axis=-1, keepdims=True),
                                     EPS * EPS))


# ----------------------------------------------------------------------------
# Single fused kernel: node encoder + gather + 4x HGNN + glue + head + logits
# ----------------------------------------------------------------------------
def pass_kernel(xb_ref, wb_ref, bsel_ref, ids_ref, a_ref, m_ref,
                wh_ref, bh_ref, logits_ref):
    D = wb_ref.shape[1]

    # ---- node encoder: one block-diagonal matmul + per-node bias + normalize.
    # TODO(synk): at production node counts, group nodes by type (scalar-
    # prefetched group offsets, MoE-style index_map) to drop the 3x nominal
    # MACs spent on the zeroed input thirds.
    h = _mm(xb_ref[...], wb_ref[...]) + bsel_ref[...]              # (n_nodes, D)
    h = _l2n_kernel(h)

    # ---- node -> graph gather, fully in-kernel: one-hot built from the int32
    # index vector, gathered with one MXU matmul (no HBM round trip).
    # TODO(synk): at production num_nodes replace with pl.Element row-gather /
    # manual DMA gather (one-hot cost is O(num_nodes) per row).
    n_nodes = h.shape[0]
    gbn = ids_ref.shape[0]
    onehot = (lax.broadcasted_iota(jnp.int32, (gbn, n_nodes), 1)
              == ids_ref[...]).astype(jnp.float32)
    x_flat = _mm(onehot, h)                                        # (G*B*N, D)

    a = a_ref[...]                                                 # (G,B,N,M)
    msk = m_ref[...]                                               # (G,B,1,M)
    G, B, N, M = a.shape
    K = G * B

    a_k = a.reshape(K, N, M)
    msk_k = msk.reshape(K, 1, M)
    x_k = x_flat.reshape(K, N, D)

    # ---- 4x HGNN, reassociated:  num = ((center * mask * 1/deg) . A) . X
    # Both contractions on the MXU, batched over all 4*B graphs at once;
    # divides replaced by reciprocal-multiplies.
    deg = jnp.sum(a_k, axis=1, keepdims=True)                      # (K,1,M)
    inv_deg = pl.reciprocal(jnp.where(deg == 0.0, 1.0, deg), approx=False)
    w_k = a_k[:, 0:1, :] * msk_k * inv_deg                         # (K,1,M)
    coef = jnp.einsum('kom,knm->kon', w_k, a_k,
                      preferred_element_type=jnp.float32)          # (K,1,N)
    num = jnp.einsum('kon,knd->kod', coef, x_k,
                     preferred_element_type=jnp.float32)[:, 0, :]  # (K,D)

    # NodeAggregateLayer divisor, reproducing the torch broadcasting quirk:
    # every batch element is divided by the center degree of batch element 0
    # of its own graph type.  Folded with the *0.5 glue into one scalar
    # multiply per graph type (no per-element divide).
    csum0 = jnp.sum(a[:, 0, 0:1, :], axis=-1, keepdims=True)       # (G,1,1)
    scale = 0.5 / csum0                                            # (G,1,1)

    num_gb = num.reshape(G, B, D)
    center_gb = x_k[:, 0, :].reshape(G, B, D)
    avg = num_gb * scale + center_gb * 0.5                         # (G,B,D)

    # ---- lane-dense packing: graph types [u,q,k,d] along the lane axis
    # (4*D = 128 lanes), then ONE head matmul computing both uq/dk projections.
    packed = jnp.concatenate([avg[0], avg[1], avg[2], avg[3]], axis=-1)  # (B,4D)
    o12 = _mm(packed, wh_ref[...]) + bh_ref[...]                   # (B,2D)

    o1 = _l2n_kernel(o12[:, :D])
    o2 = _l2n_kernel(o12[:, D:])

    # logits = o1 @ o2^T without materializing the transpose.
    logits_ref[...] = lax.dot_general(
        o1.astype(MXU_DTYPE), o2.astype(MXU_DTYPE),
        dimension_numbers=(((1,), (1,)), ((), ())),
        preferred_element_type=jnp.float32)


# ----------------------------------------------------------------------------
# Wrapper: XLA-side prep (embedding gathers, type masks, block weights) + call
# ----------------------------------------------------------------------------
def pass_forward(params, input_ids, node_types, batch_node_id,
                 batch_adj_matrix, batch_edge_type):
    tok = input_ids[:, 0]
    u_emb = params["user_emb"][tok]
    d_emb = params["domain_emb"][tok]
    # TODO(synk): BERT (q_model / k_model) [CLS] representation has no compact
    # Pallas equivalent; substituted by a deterministic token-embedding lookup.
    t_emb = params["text_emb"][tok]

    t = node_types[:, None]
    is_u = (t == U_TYPE).astype(jnp.float32)
    is_d = (t == D_TYPE).astype(jnp.float32)
    is_qk = ((t == Q_TYPE) | (t == K_TYPE)).astype(jnp.float32)

    # Block-diagonal formulation of the per-type projection: zero-masked wide
    # input against stacked [w_u; w_d; w_q] -> one (n, D) result, no in-kernel
    # select, no node_types tile.
    x_big = jnp.concatenate([u_emb * is_u, d_emb * is_d, t_emb * is_qk], axis=-1)
    w_block = jnp.concatenate([params["w_u"], params["w_d"], params["w_q"]], axis=0)
    b_sel = is_u * params["b_u"] + is_d * params["b_d"] + is_qk * params["b_q"]

    G, B, N = batch_node_id.shape
    M = batch_adj_matrix.shape[3]
    D = params["w_u"].shape[1]
    n_nodes, enc3 = x_big.shape
    gbn = G * B * N
    K = G * B

    ids = batch_node_id.reshape(gbn, 1).astype(jnp.int32)

    ones_mask = jnp.ones((B, 1, M), jnp.float32)
    mask_q = (batch_edge_type[1] == UT_TYPE).astype(jnp.float32)[:, None, :]
    mask_k = (batch_edge_type[2] == DO_TYPE).astype(jnp.float32)[:, None, :]
    masks = jnp.stack([ones_mask, mask_q, mask_k, ones_mask], axis=0)   # (G,B,1,M)

    # Block head weight: columns [0:D] produce the uq projection from the
    # [u | q] lanes, columns [D:2D] the dk projection from the [k | d] lanes.
    w_head = jnp.zeros((4 * D, 2 * D), jnp.float32)
    w_head = w_head.at[0 * D:1 * D, 0:D].set(params["w_uq"][:D])        # u
    w_head = w_head.at[1 * D:2 * D, 0:D].set(params["w_uq"][D:])        # q
    w_head = w_head.at[2 * D:3 * D, D:2 * D].set(params["w_dk"][D:])    # k
    w_head = w_head.at[3 * D:4 * D, D:2 * D].set(params["w_dk"][:D])    # d
    b_head = jnp.concatenate([params["b_uq"], params["b_dk"]], axis=-1)

    flops = 2 * (n_nodes * enc3 * D          # node encoder matmul
                 + gbn * n_nodes * D         # one-hot gather matmul
                 + K * N * M                 # coef contraction
                 + K * N * D                 # num contraction
                 + B * (4 * D) * (2 * D)     # head matmul
                 + B * D * B)                # logits
    bytes_accessed = 4 * (x_big.size + w_block.size + b_sel.size + ids.size
                          + batch_adj_matrix.size + masks.size
                          + w_head.size + b_head.size + B * B)
    cost = pl.CostEstimate(flops=int(flops),
                           transcendentals=int(n_nodes + 2 * B),
                           bytes_accessed=int(bytes_accessed))

    return pl.pallas_call(
        pass_kernel,
        out_shape=jax.ShapeDtypeStruct((B, B), jnp.float32),
        grid=(1,),
        in_specs=[
            pl.BlockSpec((n_nodes, enc3), lambda i: (0, 0)),
            pl.BlockSpec((enc3, D), lambda i: (0, 0)),
            pl.BlockSpec((n_nodes, D), lambda i: (0, 0)),
            pl.BlockSpec((gbn, 1), lambda i: (0, 0)),
            pl.BlockSpec((G, B, N, M), lambda i: (0, 0, 0, 0)),
            pl.BlockSpec((G, B, 1, M), lambda i: (0, 0, 0, 0)),
            pl.BlockSpec((4 * D, 2 * D), lambda i: (0, 0)),
            pl.BlockSpec((1, 2 * D), lambda i: (0, 0)),
        ],
        out_specs=pl.BlockSpec((B, B), lambda i: (0, 0)),
        compiler_params=pltpu.CompilerParams(dimension_semantics=("arbitrary",)),
        cost_estimate=cost,
    )(x_big, w_block, b_sel, ids, batch_adj_matrix, masks, w_head, b_head)


# ----------------------------------------------------------------------------
# Pure-JAX reference (original torch math, no reordering) for correctness
# ----------------------------------------------------------------------------
def _l2n(x):
    return x / jnp.maximum(jnp.linalg.norm(x, axis=-1, keepdims=True), EPS)


def ref_node_encoder(params, input_ids, node_types):
    tok = input_ids[:, 0]
    u_h = params["user_emb"][tok] @ params["w_u"] + params["b_u"]
    d_h = params["domain_emb"][tok] @ params["w_d"] + params["b_d"]
    q_h = params["text_emb"][tok] @ params["w_q"] + params["b_q"]
    t = node_types[:, None]
    h = jnp.where(t == U_TYPE, u_h, jnp.zeros_like(u_h))
    h = jnp.where(t == D_TYPE, d_h, h)
    h = jnp.where((t == Q_TYPE) | (t == K_TYPE), q_h, h)
    return _l2n(h)


def ref_hgnn(x, a, mask):
    deg = jnp.sum(a, axis=1)[..., None]
    deg = jnp.where(deg == 0.0, 1.0, deg)
    xe = jnp.einsum("bnm,bnd->bmd", a, x) / deg
    xe = xe * jnp.transpose(mask, (0, 2, 1))
    center = a[:, :1, :]
    ev = jnp.einsum("bom,bmd->bod", center, xe)
    csum = jnp.sum(center, axis=2)
    return ev[:, 0, :] / csum[0, 0]          # torch-broadcasting-quirk-exact


def ref_forward(params, input_ids, node_types, batch_node_id,
                batch_adj_matrix, batch_edge_type):
    node_emb = ref_node_encoder(params, input_ids, node_types)
    Xs = [node_emb[batch_node_id[i]] for i in range(4)]
    B, _, M = batch_adj_matrix[0].shape
    ones_mask = jnp.ones((B, 1, M), jnp.float32)
    mask_q = (batch_edge_type[1] == UT_TYPE).astype(jnp.float32)[:, None, :]
    mask_k = (batch_edge_type[2] == DO_TYPE).astype(jnp.float32)[:, None, :]
    masks = [ones_mask, mask_q, mask_k, ones_mask]
    hs = [ref_hgnn(Xs[i], batch_adj_matrix[i], masks[i]) for i in range(4)]
    u, q, k, d = [(hs[i] + Xs[i][:, 0]) / 2.0 for i in range(4)]
    uq = jnp.concatenate([u, q], -1)
    dk = jnp.concatenate([d, k], -1)
    o1 = _l2n(uq @ params["w_uq"] + params["b_uq"])
    o2 = _l2n(dk @ params["w_dk"] + params["b_dk"])
    return o1 @ o2.T


# ----------------------------------------------------------------------------
def init_params(key, encoder_dim, node_dim, vocab):
    ks = jax.random.split(key, 11)
    s = 0.1
    return {
        "user_emb": s * jax.random.normal(ks[0], (vocab, encoder_dim), jnp.float32),
        "domain_emb": s * jax.random.normal(ks[1], (vocab, encoder_dim), jnp.float32),
        "text_emb": s * jax.random.normal(ks[2], (vocab, encoder_dim), jnp.float32),
        "w_u": s * jax.random.normal(ks[3], (encoder_dim, node_dim), jnp.float32),
        "b_u": s * jax.random.normal(ks[4], (1, node_dim), jnp.float32),
        "w_d": s * jax.random.normal(ks[5], (encoder_dim, node_dim), jnp.float32),
        "b_d": s * jax.random.normal(ks[6], (1, node_dim), jnp.float32),
        "w_q": s * jax.random.normal(ks[7], (encoder_dim, node_dim), jnp.float32),
        "b_q": s * jax.random.normal(ks[8], (1, node_dim), jnp.float32),
        "w_uq": s * jax.random.normal(ks[9], (2 * node_dim, node_dim), jnp.float32),
        "b_uq": jnp.zeros((1, node_dim), jnp.float32),
        "w_dk": s * jax.random.normal(ks[10], (2 * node_dim, node_dim), jnp.float32),
        "b_dk": jnp.zeros((1, node_dim), jnp.float32),
    }


if __name__ == "__main__":
    # Small, deterministic problem sizes
    encoder_dim = 32
    node_dim = 32
    num_nodes = 16     # global node pool
    seq_len = 6
    vocab = 64
    B = 2              # number of graph instances in the batch
    N = 8              # nodes per graph
    M = 8              # hyperedges per graph

    key = jax.random.PRNGKey(0)
    kp, k1, k2, k3, k4, k5 = jax.random.split(key, 6)
    params = init_params(kp, encoder_dim, node_dim, vocab)

    input_ids = jax.random.randint(k1, (num_nodes, seq_len), 0, vocab, dtype=jnp.int32)
    node_types = jax.random.randint(k2, (num_nodes,), 0, 4, dtype=jnp.int32)
    batch_node_id = jax.random.randint(k3, (4, B, N), 0, num_nodes, dtype=jnp.int32)
    A = (jax.random.uniform(k4, (4, B, N, M)) > 0.5).astype(jnp.float32)
    A = A.at[:, :, 0, :].set(1.0)  # ensure center node has nonzero degree
    batch_edge_type = jax.random.randint(k5, (4, B, M), 0, 4, dtype=jnp.int32)

    fwd = jax.jit(pass_forward)
    logits = jax.block_until_ready(
        fwd(params, input_ids, node_types, batch_node_id, A, batch_edge_type))

    ref = jax.block_until_ready(
        ref_forward(params, input_ids, node_types, batch_node_id, A, batch_edge_type))
    np.testing.assert_allclose(np.asarray(logits), np.asarray(ref), rtol=1e-3, atol=1e-3)

    print("KERNEL_OK")
</pallas_src>

<mosaic_0001>
module attributes {stable_mosaic.version = 11 : i64} {
  func.func @pass_kernel(%arg0: i32, %arg1: memref<16x96xf32, #tpu.memory_space<vmem>>, %arg2: memref<96x32xf32, #tpu.memory_space<vmem>>, %arg3: memref<16x32xf32, #tpu.memory_space<vmem>>, %arg4: memref<64x1xi32, #tpu.memory_space<vmem>>, %arg5: memref<4x2x8x8xf32, #tpu.memory_space<vmem>>, %arg6: memref<4x2x1x8xf32, #tpu.memory_space<vmem>>, %arg7: memref<128x64xf32, #tpu.memory_space<vmem>>, %arg8: memref<1x64xf32, #tpu.memory_space<vmem>>, %arg9: memref<2x2xf32, #tpu.memory_space<vmem>>) attributes {dimension_semantics = [#tpu.dimension_semantics<arbitrary>], iteration_bounds = array<i64: 1>, scalar_prefetch = 0 : i64, scratch_operands = 0 : i64, tpu.core_type = #tpu.core_type<tc>, window_params = [{pipeline_mode = #tpu.pipeline_mode<synchronous>, transform_indices = @transform_0, window_bounds = array<i64: 16, 96>}, {pipeline_mode = #tpu.pipeline_mode<synchronous>, transform_indices = @transform_1, window_bounds = array<i64: 96, 32>}, {pipeline_mode = #tpu.pipeline_mode<synchronous>, transform_indices = @transform_2, window_bounds = array<i64: 16, 32>}, {pipeline_mode = #tpu.pipeline_mode<synchronous>, transform_indices = @transform_3, window_bounds = array<i64: 64, 1>}, {pipeline_mode = #tpu.pipeline_mode<synchronous>, transform_indices = @transform_4, window_bounds = array<i64: 4, 2, 8, 8>}, {pipeline_mode = #tpu.pipeline_mode<synchronous>, transform_indices = @transform_5, window_bounds = array<i64: 4, 2, 1, 8>}, {pipeline_mode = #tpu.pipeline_mode<synchronous>, transform_indices = @transform_6, window_bounds = array<i64: 128, 64>}, {pipeline_mode = #tpu.pipeline_mode<synchronous>, transform_indices = @transform_7, window_bounds = array<i64: 1, 64>}, {pipeline_mode = #tpu.pipeline_mode<synchronous>, transform_indices = @transform_8, window_bounds = array<i64: 2, 2>}]} {
    %c0 = arith.constant 0 : index
    %c0_0 = arith.constant 0 : index
    %0 = vector.load %arg1[%c0, %c0_0] : memref<16x96xf32, #tpu.memory_space<vmem>>, vector<16x96xf32>
    %c0_1 = arith.constant 0 : index
    %c0_2 = arith.constant 0 : index
    %1 = vector.load %arg2[%c0_1, %c0_2] : memref<96x32xf32, #tpu.memory_space<vmem>>, vector<96x32xf32>
    %cst = arith.constant dense<0.000000e+00> : vector<16x32xf32>
    %2 = tpu.matmul %0, %1, %cst {dimension_numbers = #tpu.dot_dimension_numbers<[1], [0], [0], [1], [0, 0, 1, 1], [], []>} : vector<16x96xf32>, vector<96x32xf32>, vector<16x32xf32> -> vector<16x32xf32>
    %c0_3 = arith.constant 0 : index
    %c0_4 = arith.constant 0 : index
    %3 = vector.load %arg3[%c0_3, %c0_4] : memref<16x32xf32, #tpu.memory_space<vmem>>, vector<16x32xf32>
    %4 = arith.addf %2, %3 : vector<16x32xf32>
    %5 = arith.mulf %4, %4 : vector<16x32xf32>
    %cst_5 = arith.constant dense<0.000000e+00> : vector<16xf32>
    %6 = vector.multi_reduction <add>, %5, %cst_5 [1] : vector<16x32xf32> to vector<16xf32>
    %7 = vector.shape_cast %6 : vector<16xf32> to vector<16x1xf32>
    %cst_6 = arith.constant 1.000000e-24 : f32
    %8 = vector.broadcast %cst_6 : f32 to vector<16x1xf32>
    %9 = arith.maximumf %7, %8 : vector<16x1xf32>
    %10 = math.rsqrt %9 : vector<16x1xf32>
    %11 = vector.broadcast %10 : vector<16x1xf32> to vector<16x32xf32>
    %12 = arith.mulf %4, %11 : vector<16x32xf32>
    %13 = tpu.iota {dimensions = array<i32: 1>} : vector<64x16xi32>
    %c0_7 = arith.constant 0 : index
    %c0_8 = arith.constant 0 : index
    %14 = vector.load %arg4[%c0_7, %c0_8] : memref<64x1xi32, #tpu.memory_space<vmem>>, vector<64x1xi32>
    %15 = vector.broadcast %14 : vector<64x1xi32> to vector<64x16xi32>
    %16 = arith.cmpi eq, %13, %15 : vector<64x16xi32>
    %17 = arith.extui %16 : vector<64x16xi1> to vector<64x16xi32>
    %18 = arith.sitofp %17 : vector<64x16xi32> to vector<64x16xf32>
    %cst_9 = arith.constant dense<0.000000e+00> : vector<64x32xf32>
    %19 = tpu.matmul %18, %12, %cst_9 {dimension_numbers = #tpu.dot_dimension_numbers<[1], [0], [0], [1], [0, 0, 1, 1], [], []>} : vector<64x16xf32>, vector<16x32xf32>, vector<64x32xf32> -> vector<64x32xf32>
    %c0_10 = arith.constant 0 : index
    %c0_11 = arith.constant 0 : index
    %c0_12 = arith.constant 0 : index
    %c0_13 = arith.constant 0 : index
    %20 = vector.load %arg5[%c0_10, %c0_11, %c0_12, %c0_13] : memref<4x2x8x8xf32, #tpu.memory_space<vmem>>, vector<4x2x8x8xf32>
    %c0_14 = arith.constant 0 : index
    %c0_15 = arith.constant 0 : index
    %c0_16 = arith.constant 0 : index
    %c0_17 = arith.constant 0 : index
    %21 = vector.load %arg6[%c0_14, %c0_15, %c0_16, %c0_17] : memref<4x2x1x8xf32, #tpu.memory_space<vmem>>, vector<4x2x1x8xf32>
    %22 = vector.shape_cast %20 : vector<4x2x8x8xf32> to vector<8x8x8xf32>
    %23 = vector.shape_cast %21 : vector<4x2x1x8xf32> to vector<8x1x8xf32>
    %24 = vector.shape_cast %19 : vector<64x32xf32> to vector<8x8x32xf32>
    %cst_18 = arith.constant dense<0.000000e+00> : vector<8x8xf32>
    %25 = vector.multi_reduction <add>, %22, %cst_18 [1] : vector<8x8x8xf32> to vector<8x8xf32>
    %26 = vector.shape_cast %25 : vector<8x8xf32> to vector<8x1x8xf32>
    %cst_19 = arith.constant 0.000000e+00 : f32
    %27 = vector.broadcast %cst_19 : f32 to vector<8x1x8xf32>
    %28 = arith.cmpf oeq, %26, %27 : vector<8x1x8xf32>
    %cst_20 = arith.constant 1.000000e+00 : f32
    %29 = vector.broadcast %cst_20 : f32 to vector<8x1x8xf32>
    %30 = arith.select %28, %29, %26 : vector<8x1x8xi1>, vector<8x1x8xf32>
    %31 = tpu.reciprocal %30 : vector<8x1x8xf32> -> vector<8x1x8xf32>
    %32 = vector.extract_strided_slice %22 {offsets = [0, 0, 0], sizes = [8, 1, 8], strides = [1, 1, 1]} : vector<8x8x8xf32> to vector<8x1x8xf32>
    %33 = arith.mulf %32, %23 : vector<8x1x8xf32>
    %34 = arith.mulf %33, %31 : vector<8x1x8xf32>
    "tpu.trace_start"() <{level = 10 : i32, message = "kom,knm->kon"}> : () -> ()
    %cst_21 = arith.constant dense<0.000000e+00> : vector<8x1x8xf32>
    %35 = tpu.matmul %34, %22, %cst_21 {dimension_numbers = #tpu.dot_dimension_numbers<[2], [2], [1], [1], [0, 0, 0, 1, 1, 1], [0], [0]>} : vector<8x1x8xf32>, vector<8x8x8xf32>, vector<8x1x8xf32> -> vector<8x1x8xf32>
    "tpu.trace_stop"() : () -> ()
    "tpu.trace_start"() <{level = 10 : i32, message = "kon,knd->kod"}> : () -> ()
    %cst_22 = arith.constant dense<0.000000e+00> : vector<8x1x32xf32>
    %36 = tpu.matmul %35, %24, %cst_22 {dimension_numbers = #tpu.dot_dimension_numbers<[2], [1], [1], [2], [0, 0, 0, 1, 1, 2], [0], [0]>} : vector<8x1x8xf32>, vector<8x8x32xf32>, vector<8x1x32xf32> -> vector<8x1x32xf32>
    "tpu.trace_stop"() : () -> ()
    %37 = vector.shape_cast %36 : vector<8x1x32xf32> to vector<8x32xf32>
    %38 = vector.extract_strided_slice %20 {offsets = [0, 0, 0, 0], sizes = [4, 1, 1, 8], strides = [1, 1, 1, 1]} : vector<4x2x8x8xf32> to vector<4x1x1x8xf32>
    %39 = vector.shape_cast %38 : vector<4x1x1x8xf32> to vector<4x1x8xf32>
    %cst_23 = arith.constant dense<0.000000e+00> : vector<4x1xf32>
    %40 = vector.multi_reduction <add>, %39, %cst_23 [2] : vector<4x1x8xf32> to vector<4x1xf32>
    %41 = vector.shape_cast %40 : vector<4x1xf32> to vector<4x1x1xf32>
    %cst_24 = arith.constant 5.000000e-01 : f32
    %42 = vector.broadcast %cst_24 : f32 to vector<4x1x1xf32>
    %43 = arith.divf %42, %41 : vector<4x1x1xf32>
    %44 = vector.shape_cast %37 : vector<8x32xf32> to vector<4x2x32xf32>
    %45 = vector.extract_strided_slice %24 {offsets = [0, 0, 0], sizes = [8, 1, 32], strides = [1, 1, 1]} : vector<8x8x32xf32> to vector<8x1x32xf32>
    %46 = vector.shape_cast %45 : vector<8x1x32xf32> to vector<8x32xf32>
    %47 = vector.shape_cast %46 : vector<8x32xf32> to vector<4x2x32xf32>
    %48 = vector.broadcast %43 : vector<4x1x1xf32> to vector<4x2x32xf32>
    %49 = arith.mulf %44, %48 : vector<4x2x32xf32>
    %cst_25 = arith.constant 5.000000e-01 : f32
    %50 = vector.broadcast %cst_25 : f32 to vector<4x2x32xf32>
    %51 = arith.mulf %47, %50 : vector<4x2x32xf32>
    %52 = arith.addf %49, %51 : vector<4x2x32xf32>
    %53 = vector.extract_strided_slice %52 {offsets = [0, 0, 0], sizes = [1, 2, 32], strides = [1, 1, 1]} : vector<4x2x32xf32> to vector<1x2x32xf32>
    %54 = vector.shape_cast %53 : vector<1x2x32xf32> to vector<2x32xf32>
    %55 = vector.extract_strided_slice %52 {offsets = [1, 0, 0], sizes = [1, 2, 32], strides = [1, 1, 1]} : vector<4x2x32xf32> to vector<1x2x32xf32>
    %56 = vector.shape_cast %55 : vector<1x2x32xf32> to vector<2x32xf32>
    %57 = vector.extract_strided_slice %52 {offsets = [2, 0, 0], sizes = [1, 2, 32], strides = [1, 1, 1]} : vector<4x2x32xf32> to vector<1x2x32xf32>
    %58 = vector.shape_cast %57 : vector<1x2x32xf32> to vector<2x32xf32>
    %59 = vector.extract_strided_slice %52 {offsets = [3, 0, 0], sizes = [1, 2, 32], strides = [1, 1, 1]} : vector<4x2x32xf32> to vector<1x2x32xf32>
    %60 = vector.shape_cast %59 : vector<1x2x32xf32> to vector<2x32xf32>
    %61 = tpu.concatenate %54, %56, %58, %60 in 1 : vector<2x32xf32>, vector<2x32xf32>, vector<2x32xf32>, vector<2x32xf32> -> vector<2x128xf32>
    %c0_26 = arith.constant 0 : index
    %c0_27 = arith.constant 0 : index
    %62 = vector.load %arg7[%c0_26, %c0_27] : memref<128x64xf32, #tpu.memory_space<vmem>>, vector<128x64xf32>
    %cst_28 = arith.constant dense<0.000000e+00> : vector<2x64xf32>
    %63 = tpu.matmul %61, %62, %cst_28 {dimension_numbers = #tpu.dot_dimension_numbers<[1], [0], [0], [1], [0, 0, 1, 1], [], []>} : vector<2x128xf32>, vector<128x64xf32>, vector<2x64xf32> -> vector<2x64xf32>
    %c0_29 = arith.constant 0 : index
    %c0_30 = arith.constant 0 : index
    %64 = vector.load %arg8[%c0_29, %c0_30] : memref<1x64xf32, #tpu.memory_space<vmem>>, vector<1x64xf32>
    %65 = vector.broadcast %64 : vector<1x64xf32> to vector<2x64xf32>
    %66 = arith.addf %63, %65 : vector<2x64xf32>
    %67 = vector.extract_strided_slice %66 {offsets = [0, 0], sizes = [2, 32], strides = [1, 1]} : vector<2x64xf32> to vector<2x32xf32>
    %68 = arith.mulf %67, %67 : vector<2x32xf32>
    %cst_31 = arith.constant dense<0.000000e+00> : vector<2xf32>
    %69 = vector.multi_reduction <add>, %68, %cst_31 [1] : vector<2x32xf32> to vector<2xf32>
    %70 = vector.shape_cast %69 : vector<2xf32> to vector<2x1xf32>
    %cst_32 = arith.constant 1.000000e-24 : f32
    %71 = vector.broadcast %cst_32 : f32 to vector<2x1xf32>
    %72 = arith.maximumf %70, %71 : vector<2x1xf32>
    %73 = math.rsqrt %72 : vector<2x1xf32>
    %74 = vector.broadcast %73 : vector<2x1xf32> to vector<2x32xf32>
    %75 = arith.mulf %67, %74 : vector<2x32xf32>
    %76 = vector.extract_strided_slice %66 {offsets = [0, 32], sizes = [2, 32], strides = [1, 1]} : vector<2x64xf32> to vector<2x32xf32>
    %77 = arith.mulf %76, %76 : vector<2x32xf32>
    %cst_33 = arith.constant dense<0.000000e+00> : vector<2xf32>
    %78 = vector.multi_reduction <add>, %77, %cst_33 [1] : vector<2x32xf32> to vector<2xf32>
    %79 = vector.shape_cast %78 : vector<2xf32> to vector<2x1xf32>
    %cst_34 = arith.constant 1.000000e-24 : f32
    %80 = vector.broadcast %cst_34 : f32 to vector<2x1xf32>
    %81 = arith.maximumf %79, %80 : vector<2x1xf32>
    %82 = math.rsqrt %81 : vector<2x1xf32>
    %83 = vector.broadcast %82 : vector<2x1xf32> to vector<2x32xf32>
    %84 = arith.mulf %76, %83 : vector<2x32xf32>
    %cst_35 = arith.constant dense<0.000000e+00> : vector<2x2xf32>
    %85 = tpu.matmul %75, %84, %cst_35 {dimension_numbers = #tpu.dot_dimension_numbers<[1], [1], [0], [0], [0, 0, 1, 0], [], []>} : vector<2x32xf32>, vector<2x32xf32>, vector<2x2xf32> -> vector<2x2xf32>
    %c0_36 = arith.constant 0 : index
    %c0_37 = arith.constant 0 : index
    %86 = vector.load %arg9[%c0_36, %c0_37] : memref<2x2xf32, #tpu.memory_space<vmem>>, vector<2x2xf32>
    tpu.vector_store %arg9[%c0_36, %c0_37], %85 {strides = array<i32>} : memref<2x2xf32, #tpu.memory_space<vmem>>, vector<2x2xf32>,
    return
  }
  func.func @transform_0(%arg0: i32) -> (i32, i32) {
    %c0_i32 = arith.constant 0 : i32
    %c0_i32_0 = arith.constant 0 : i32
    %c0_i32_1 = arith.constant 0 : i32
    return %c0_i32, %c0_i32_0 : i32, i32
  }
  func.func @transform_1(%arg0: i32) -> (i32, i32) {
    %c0_i32 = arith.constant 0 : i32
    %c0_i32_0 = arith.constant 0 : i32
    %c0_i32_1 = arith.constant 0 : i32
    return %c0_i32, %c0_i32_0 : i32, i32
  }
  func.func @transform_2(%arg0: i32) -> (i32, i32) {
    %c0_i32 = arith.constant 0 : i32
    %c0_i32_0 = arith.constant 0 : i32
    %c0_i32_1 = arith.constant 0 : i32
    return %c0_i32, %c0_i32_0 : i32, i32
  }
  func.func @transform_3(%arg0: i32) -> (i32, i32) {
    %c0_i32 = arith.constant 0 : i32
    %c0_i32_0 = arith.constant 0 : i32
    %c0_i32_1 = arith.constant 0 : i32
    return %c0_i32, %c0_i32_0 : i32, i32
  }
  func.func @transform_4(%arg0: i32) -> (i32, i32, i32, i32) {
    %c0_i32 = arith.constant 0 : i32
    %c0_i32_0 = arith.constant 0 : i32
    %c0_i32_1 = arith.constant 0 : i32
    %c0_i32_2 = arith.constant 0 : i32
    %c0_i32_3 = arith.constant 0 : i32
    return %c0_i32, %c0_i32_0, %c0_i32_1, %c0_i32_2 : i32, i32, i32, i32
  }
  func.func @transform_5(%arg0: i32) -> (i32, i32, i32, i32) {
    %c0_i32 = arith.constant 0 : i32
    %c0_i32_0 = arith.constant 0 : i32
    %c0_i32_1 = arith.constant 0 : i32
    %c0_i32_2 = arith.constant 0 : i32
    %c0_i32_3 = arith.constant 0 : i32
    return %c0_i32, %c0_i32_0, %c0_i32_1, %c0_i32_2 : i32, i32, i32, i32
  }
  func.func @transform_6(%arg0: i32) -> (i32, i32) {
    %c0_i32 = arith.constant 0 : i32
    %c0_i32_0 = arith.constant 0 : i32
    %c0_i32_1 = arith.constant 0 : i32
    return %c0_i32, %c0_i32_0 : i32, i32
  }
  func.func @transform_7(%arg0: i32) -> (i32, i32) {
    %c0_i32 = arith.constant 0 : i32
    %c0_i32_0 = arith.constant 0 : i32
    %c0_i32_1 = arith.constant 0 : i32
    return %c0_i32, %c0_i32_0 : i32, i32
  }
  func.func @transform_8(%arg0: i32) -> (i32, i32) {
    %c0_i32 = arith.constant 0 : i32
    %c0_i32_0 = arith.constant 0 : i32
    %c0_i32_1 = arith.constant 0 : i32
    return %c0_i32, %c0_i32_0 : i32, i32
  }
}

</mosaic_0001>

<bundles_post_ra>
// kernel: pass_forward.1
= control target key start
LH: loop header
LB: loop body
LE: loop exit
PB: predicated region body
PF: predicated region fallthrough
CT: control target
= control target key end

     0   :  { %vm46_vm0 = vcmask 785408   ;;  %s2806_s0 = inlined_call_operand.vmem [shape: f32[16,96], index: 0, kind: input, shape index: {}]   ;;  %s2807_s1 = inlined_call_operand.vmem [shape: f32[96,32], index: 1, kind: input, shape index: {}]   ;;  %s2808_s2 = inlined_call_operand.vmem [shape: f32[16,32], index: 2, kind: input, shape index: {}]   ;;  %s2809_s3 = inlined_call_operand.vmem [shape: s32[64,1], index: 3, kind: input, shape index: {}]   ;;  %s2810_s4 = inlined_call_operand.vmem [shape: f32[4,2,8,8], index: 4, kind: input, shape index: {}]   ;;  %s2811_s5 = inlined_call_operand.vmem [shape: f32[4,2,1,8], index: 5, kind: input, shape index: {}]   ;;  %s2812_s6 = inlined_call_operand.vmem [shape: f32[128,64], index: 6, kind: input, shape index: {}]   ;;  %s2813_s7 = inlined_call_operand.vmem [shape: f32[1,64], index: 7, kind: input, shape index: {}]   ;;  %s2814_s8 = inlined_call_operand.hbm [shape: f32[2,2], index: 8, kind: output, shape index: {}]  }
   0x1   :  { %v32_v0 = vld [vmem:[%s2807_s1] sm:$0xff]  ;;  %v33_v1 = vld [vmem:[%s2807_s1 + $0x8] sm:$0xff]  ;;  %v34_v2 = vld [vmem:[%s2807_s1 + $0x10] sm:$0xff] }
   0x2   :  { %v2216_v3 = vpack.c.bf16 %v33_v1, %v32_v0  ;;  %v35_v4 = vld [vmem:[%s2807_s1 + $0x18] sm:$0xff]  ;;  %v36_v6 = vld [vmem:[%s2807_s1 + $0x20] sm:$0xff]  ;;  %v37_v7 = vld [vmem:[%s2807_s1 + $0x28] sm:$0xff] }
   0x3   :  { %v2220_v5 = vpack.c.bf16 %v35_v4, %v34_v2  ;;  %v30_v8 = vld [vmem:[%s2806_s0] sm:$0xff]  ;;  %v2224_v9 = vpack.c.bf16 %v37_v7, %v36_v6 }
   0x4   :  { %2217 = vmatprep.subr.bf16.mxu1 %v2216_v3  ;;  %2077 = vmatprep.mubr.msk.f32.mxu1 %vm46_vm0, %v30_v8 }
   0x5   :  { %2219 = vmatpush3.bf16.msra.mxu1 %v2216_v3 }
   0x6   :  { %2221 = vmatprep.subr.bf16.mxu1 %v2220_v5 }
   0x7   :  { %13 = vsyncpa [#allocation3], 0  ;;  %v38_v10 = vld [vmem:[%s2807_s1 + $0x30] sm:$0xff]  ;;  %v39_v11 = vld [vmem:[%s2807_s1 + $0x38] sm:$0xff]  ;;  %v2336_v21 = vmov 0   ;;  %vm130_vm1 = vcmask 261120   ;;  %v143_v38 = vlaneseq }
   0x8   :  { %v2228_v12 = vpack.c.bf16 %v39_v11, %v38_v10  ;;  %v40_v13 = vld [vmem:[%s2807_s1 + $0x40] sm:$0xff]  ;;  %v41_v14 = vld [vmem:[%s2807_s1 + $0x48] sm:$0xff]  ;;  %v42_v16 = vld [vmem:[%s2807_s1 + $0x50] sm:$0xff]  ;;  %2278 = vset.pattern.permute.xlu1 %v2336_v21  ;;  %2279 = vset.pattern.permute.xlu0 %v2336_v21  ;;  %v2337_v41 = vmov 0.0   ;;  %vm201_vm3 = vcmask 130048   ;;  %vm347_vm4 = vcmask 64512  }
   0x9   :  { %2223 = vmatpush3.bf16.msra.mxu1 %v2220_v5  ;;  %v2232_v15 = vpack.c.bf16 %v41_v14, %v40_v13  ;;  %v43_v17 = vld [vmem:[%s2807_s1 + $0x58] sm:$0xff]  ;;  %v31_v19 = vld [vmem:[%s2806_s0 + $0x8] sm:$0xff]  ;;  %v151_v20 = vld [vmem:[%s2809_s3 + $0x30] sm:$0xff]  ;;  %v2471_v39 = vand.u32 127, %v143_v38  ;;  %s2341_s1 = smov 64   ;;  %s2342_s13 = smov 96  }
   0xa   :  { %2225 = vmatprep.subr.bf16.mxu1 %v2224_v9  ;;  %v2236_v18 = vpack.c.bf16 %v43_v17, %v42_v16  ;;  %172 = vperm.xlu1 %2278, %v151_v20   ;;  %v152_v22 = vld [vmem:[%s2809_s3 + $0x38] sm:$0xff]  ;;  %v146_v23 = vld [vmem:[%s2809_s3 + $0x8] sm:$0xff]  ;;  %v147_v24 = vld [vmem:[%s2809_s3 + $0x10] sm:$0xff] }
   0xb   :  { %v148_v25 = vld [vmem:[%s2809_s3 + $0x18] sm:$0xff]  ;;  %v149_v26 = vld [vmem:[%s2809_s3 + $0x20] sm:$0xff]  ;;  %v150_v27 = vld [vmem:[%s2809_s3 + $0x28] sm:$0xff] }
   0xc   :  { %v45_v28 = vld [vmem:[%s2808_s2 + $0x8] sm:$0xff]  ;;  %v44_v29 = vld [vmem:[%s2808_s2] sm:$0xff]  ;;  %v2489_v46 = vld [vmem:[%s2810_s4 + $0x10] sm:$0xff] }
   0xd   :  { %2227 = vmatpush3.bf16.msra.mxu1 %v2224_v9  ;;  %v145_v43 = vld [vmem:[%s2809_s3] sm:$0xff]  ;;  %v2494_v48 = vld [vmem:[%s2810_s4 + $0x8] sm:$0xff]  ;;  %v362_v49 = vsel %vm347_vm4, %v2489_v46, 0.0  ;;  %v2508_v53 = vld [vmem:[%s2810_s4 + $0x18] sm:$0xff] }
   0xe   :  { %2229 = vmatprep.subr.bf16.mxu1 %v2228_v12  ;;  %175 = vperm.xlu1 %2278, %v152_v22   ;;  %v2482_v44 = vld [vmem:[%s2810_s4] sm:$0xff]  ;;  %v355_v50 = vsel %vm347_vm4, %v2494_v48, 0.0  ;;  %v363_v54 = vrot.slane %v362_v49, 4  ;;  %v369_v57 = vsel %vm347_vm4, %v2508_v53, 0.0  ;;  %v2517_v58 = vld [vmem:[%s2810_s4 + $0x30] sm:$0xff]  ;;  %v2522_v60 = vld [vmem:[%s2810_s4 + $0x28] sm:$0xff] }
   0xf   :  { %v348_v45 = vsel %vm347_vm4, %v2482_v44, 0.0  ;;  %v2503_v51 = vld [vmem:[%s2810_s4 + $0x20] sm:$0xff]  ;;  %v356_v55 = vrot.slane %v355_v50, 4  ;;  %v370_v0 = vrot.slane %v369_v57, 4  ;;  %v390_v1 = vsel %vm347_vm4, %v2517_v58, 0.0  ;;  %v2533_v5 = vld [vmem:[%s2810_s4 + $0x38] sm:$0xff] }
  0x10   :  { %v349_v47 = vrot.slane %v348_v45, 4  ;;  %v376_v56 = vsel %vm347_vm4, %v2503_v51, 0.0  ;;  %v364_v61 = vadd.f32 %v363_v54, %v362_v49  ;;  %v383_v3 = vsel %vm347_vm4, %v2522_v60, 0.0 }
  0x11   :  { %2231 = vmatpush3.bf16.msra.mxu1 %v2228_v12  ;;  %v377_v62 = vrot.slane %v376_v56, 4  ;;  %v357_v63 = vadd.f32 %v356_v55, %v355_v50  ;;  %v391_v8 = vrot.slane %v390_v1, 4  ;;  %v371_v11 = vadd.f32 %v370_v0, %v369_v57 }
  0x12   :  { %2233 = vmatprep.subr.bf16.mxu1 %v2232_v15  ;;  %157 = vperm.xlu1 %2278, %v146_v23   ;;  %v350_v52 = vadd.f32 %v349_v47, %v348_v45  ;;  %v365_v6 = vrot.slane %v364_v61, 2  ;;  %v384_v12 = vrot.slane %v383_v3, 4  ;;  %v397_v14 = vsel %vm347_vm4, %v2533_v5, 0.0 }
  0x13   :  { %v378_v7 = vadd.f32 %v377_v62, %v376_v56  ;;  %v358_v10 = vrot.slane %v357_v63, 2  ;;  %v372_v22 = vrot.slane %v371_v11, 2 }
  0x14   :  { %v351_v59 = vrot.slane %v350_v52, 2  ;;  %v366_v17 = vadd.f32 %v365_v6, %v364_v61  ;;  %v385_v23 = vadd.f32 %v384_v12, %v383_v3  ;;  %v339_v12 = vld [vmem:[%s2811_s5] sm:$0x1] }
  0x15   :  { %2235 = vmatpush3.bf16.msra.mxu1 %v2232_v15  ;;  %v359_v21 = vadd.f32 %v358_v10, %v357_v63 }
  0x16   :  { %2237 = vmatprep.subr.bf16.mxu1 %v2236_v18  ;;  %160 = vperm.xlu1 %2278, %v147_v24   ;;  %v352_v4 = vadd.f32 %v351_v59, %v350_v52  ;;  %v398_v24 = vrot.slane %v397_v14, 4 }
  0x18   :  { %v353_v15 = vrot.slane %v352_v4, 1 }
  0x19   :  { %2239 = vmatpush3.bf16.msra.mxu1 %v2236_v18  ;;  %v379_v18 = vrot.slane %v378_v7, 2 }
  0x1a   :  { %163 = vperm.xlu1 %2278, %v148_v25  }
  0x1c   :  { %2078 = vmatmul.mubr.msk.f32.vlgmr.msra.gmra.mrb[0].mxu1 %vm46_vm0, %v31_v19  ;;  %v392_v19 = vadd.f32 %v391_v8, %v390_v1 }
  0x1e   :  { %166 = vperm.xlu1 %2278, %v149_v26   ;;  %v354_v26 = vadd.f32 %v353_v15, %v352_v4 }
  0x20   :  { %vm404_vm5 = vcmp.eq.f32.partialorder %v354_v26, 0.0 }
  0x21   :  { %v412_v56 = vsel %vm404_vm5, 1.0, %v354_v26 }
  0x22   :  { %169 = vperm.xlu1 %2278, %v150_v27   ;;  %v367_v27 = vrot.slane %v366_v17, 1 }
  0x89   :  { %v173_v40 = vpop.permute.xlu1 %172 }
  0x8a   :  { %vm183_vm2 = vcmp.eq.s32.totalorder %v2471_v39, %v173_v40 }
  0x8b   :  { %v1941_v42 = vsel %vm183_vm2, 1.0, %v2337_v41 }
  0x8c   :  { %2093 = vmatprep.mubr.msk.f32.mxu1 %vm201_vm3, %v1941_v42 }
  0x8d   :  { %v2526_v2 = vpop.permute.xlu1 %175 }
  0x8e   :  { %vm184_vm11 = vcmp.eq.s32.totalorder %v2471_v39, %v2526_v2 }
  0x91   :  { %v2537_v16 = vpop.permute.xlu1 %157 }
  0x92   :  { %vm178_vm12 = vcmp.eq.s32.totalorder %v2471_v39, %v2537_v16  ;;  %v341_v16 = vld [vmem:[%s2811_s5 + $0x2] sm:$0x1] }
  0x93   :  { %v1936_v15 = vsel %vm178_vm12, 1.0, %v2337_v41 }
  0xef   :  { %v2079_v30 = vpop.f32.mrb[0].mxu1 }
  0xf0   :  { %v119_v31 = vpop.f32.mrb[1].mxu1  ;;  %v2460_v32 = vadd.f32 %v2079_v30, %v45_v28  ;;  %v380_v28 = vadd.f32 %v379_v18, %v378_v7  ;;  %v360_v30 = vrot.slane %v359_v21, 1 }
  0xf1   :  { %v2462_v33 = vadd.f32 %v119_v31, %v44_v29  ;;  %v393_v29 = vrot.slane %v392_v19, 2  ;;  %v373_v31 = vadd.f32 %v372_v22, %v371_v11  ;;  %v340_v22 = vld [vmem:[%s2811_s5 + $0x1] sm:$0x1] }
  0xf2   :  { %v129_v36 = vmul.f32 %v2460_v32, %v2460_v32  ;;  %v381_v40 = vrot.slane %v380_v28, 1  ;;  %v361_v45 = vadd.f32 %v360_v30, %v359_v21 }
  0xf3   :  { %v128_v34 = vmul.f32 %v2462_v33, %v2462_v33  ;;  %v394_v42 = vadd.f32 %v393_v29, %v392_v19  ;;  %v374_v47 = vrot.slane %v373_v31, 1  ;;  %v428_v19 = vmul.f32 %v339_v12, %v2482_v44  ;;  %v343_v29 = vld [vmem:[%s2811_s5 + $0x4] sm:$0x1] }
  0xf4   :  { %v134_v37 = vsel %vm130_vm1, %v129_v36, 0.0  ;;  %v161_v36 = vpop.permute.xlu1 %160  ;;  %v382_v57 = vadd.f32 %v381_v40, %v380_v28  ;;  %vm405_vm8 = vcmp.eq.f32.partialorder %v361_v45, 0.0  ;;  %v429_v28 = vmul.f32 %v340_v22, %v2494_v48  ;;  %v1730_v22 = vld [vmem:[%s2812_s6 + $0x10] sm:$0xff] }
  0xf5   :  { %v131_v35 = vsel %vm130_vm1, %v128_v34, 0.0  ;;  %v386_v34 = vrot.slane %v385_v23, 2  ;;  %v395_v59 = vrot.slane %v394_v42, 1  ;;  %v375_v61 = vadd.f32 %v374_v47, %v373_v31  ;;  %v344_v47 = vld [vmem:[%s2811_s5 + $0x5] sm:$0x1] }
  0xf6   :  { %132 = vadd.xlane.f32.xlu0 %v131_v35  ;;  %v399_v35 = vadd.f32 %v398_v24, %v397_v14  ;;  %v413_v6 = vsel %vm405_vm8, 1.0, %v361_v45  ;;  %vm408_vm9 = vcmp.eq.f32.partialorder %v382_v57, 0.0  ;;  %vm179_vm13 = vcmp.eq.s32.totalorder %v2471_v39, %v161_v36 }
  0xf7   :  { %v387_v49 = vadd.f32 %v386_v34, %v385_v23  ;;  %v396_v7 = vadd.f32 %v395_v59, %v394_v42  ;;  %vm407_vm10 = vcmp.eq.f32.partialorder %v375_v61, 0.0  ;;  %v1942_v14 = vsel %vm184_vm11, 1.0, %v2337_v41 }
  0xf8   :  { %v400_v50 = vrot.slane %v399_v35, 2  ;;  %v164_v55 = vpop.permute.xlu1 %163  ;;  %v432_v36 = vmul.f32 %v343_v29, %v2503_v51  ;;  %v1734_v29 = vld [vmem:[%s2812_s6 + $0x30] sm:$0xff] }
  0xf9   :  { %v388_v62 = vrot.slane %v387_v49, 1  ;;  %vm410_vm14 = vcmp.eq.f32.partialorder %v396_v7, 0.0  ;;  %vm180_vm2 = vcmp.eq.s32.totalorder %v2471_v39, %v164_v55 }
  0xfa   :  { %135 = vadd.xlane.f32.xlu0 %v134_v37  ;;  %v368_v37 = vadd.f32 %v367_v27, %v366_v17  ;;  %v401_v63 = vadd.f32 %v400_v50, %v399_v35  ;;  %v1937_v17 = vsel %vm179_vm13, 1.0, %v2337_v41  ;;  %v418_v18 = vsel %vm410_vm14, 1.0, %v396_v7 }
  0xfb   :  { %v1938_v23 = vsel %vm180_vm2, 1.0, %v2337_v41 }
  0xfc   :  { %vm406_vm7 = vcmp.eq.f32.partialorder %v368_v37, 0.0  ;;  %v402_v10 = vrot.slane %v401_v63, 1  ;;  %v167_v11 = vpop.permute.xlu1 %166 }
  0xfd   :  { %v414_v4 = vsel %vm406_vm7, 1.0, %v368_v37  ;;  %vm181_vm5 = vcmp.eq.s32.totalorder %v2471_v39, %v167_v11 }
  0xfe   :  { %v1939_v24 = vsel %vm181_vm5, 1.0, %v2337_v41 }
 0x100   :  { %v170_v2 = vpop.permute.xlu1 %169 }
 0x101   :  { %vm182_vm8 = vcmp.eq.s32.totalorder %v2471_v39, %v170_v2 }
 0x102   :  { %v1940_v34 = vsel %vm182_vm8, 1.0, %v2337_v41 }
 0x110   :  { %154 = vperm.xlu0 %2279, %v145_v43  }
 0x183   :  { %v133_v9 = vpop.xlane.xlu0 %132 }
 0x184   :  { %v137_v13 = vmax.f32 %v133_v9, 1e-24  ;;  %v389_v9 = vadd.f32 %v388_v62, %v387_v49 }
 0x186   :  { %2280 = vrsqrt.f32 %v137_v13  ;;  %vm409_vm15 = vcmp.eq.f32.partialorder %v389_v9, 0.0  ;;  %v403_v13 = vadd.f32 %v402_v10, %v401_v63 }
 0x187   :  { %v136_v20 = vpop.xlane.xlu0 %135 }
 0x188   :  { %v138_v25 = vmax.f32 %v136_v20, 1e-24  ;;  %v417_v20 = vsel %vm409_vm15, 1.0, %v389_v9  ;;  %vm411_vm7 = vcmp.eq.f32.partialorder %v403_v13, 0.0 }
 0x189   :  { %v419_v30 = vsel %vm411_vm7, 1.0, %v403_v13 }
 0x18a   :  { %2282 = vrsqrt.f32 %v138_v25  ;;  %v430_v25 = vmul.f32 %v341_v16, %v2489_v46 }
 0x18b   :  { %2284 = vrcp.f32 %v412_v56  ;;  %v346_v56 = vld [vmem:[%s2811_s5 + $0x7] sm:$0x1] }
 0x18c   :  { %2286 = vrcp.f32 %v414_v4  ;;  %v435_v59 = vmul.f32 %v346_v56, %v2533_v5 }
 0x18d   :  { %2288 = vrcp.f32 %v413_v6 }
 0x18f   :  { %v155_v43 = vpop.permute.xlu0 %154 }
 0x190   :  { %vm177_vm6 = vcmp.eq.s32.totalorder %v2471_v39, %v155_v43  ;;  %v2281_v54 = vpop.eup %2280  ;;  %v342_v39 = vld [vmem:[%s2811_s5 + $0x3] sm:$0x1]  ;;  %v345_v43 = vld [vmem:[%s2811_s5 + $0x6] sm:$0x1] }
 0x191   :  { %v1935_v52 = vsel %vm177_vm6, 1.0, %v2337_v41  ;;  %v141_v1 = vmul.f32 %v2281_v54, %v2462_v33  ;;  %v415_v33 = vsel %vm407_vm10, 1.0, %v375_v61  ;;  %vm2338_vm6 = vmmov 0  }
 0x192   :  { %2084 = vmatprep.mubr.msk.f32.mxu0 %vm201_vm3, %v1935_v52  ;;  %v431_v42 = vmul.f32 %v342_v39, %v2508_v53  ;;  %v434_v50 = vmul.f32 %v345_v43, %v2517_v58  ;;  %v1736_v39 = vld [vmem:[%s2812_s6 + $0x40] sm:$0xff]  ;;  %vm1822_vm10 = vcmask 254976  }
 0x194   :  { %v2283_v0 = vpop.eup %2282 }
 0x195   :  { %v142_v3 = vmul.f32 %v2283_v0, %v2460_v32  ;;  %v416_v32 = vsel %vm408_vm9, 1.0, %v382_v57  ;;  %v2285_v21 = vpop.eup %2284  ;;  %vm1725_vm9 = vcmask 523264  }
 0x196   :  { %2290 = vrcp.f32 %v416_v32  ;;  %v2287_v26 = vpop.eup %2286  ;;  %v436_v27 = vmul.f32 %v2285_v21, %v428_v19  ;;  %v1729_v21 = vld [vmem:[%s2812_s6 + $0x8] sm:$0xff] }
 0x197   :  { %v2240_v8 = vpack.c.bf16 %v142_v3, %v141_v1  ;;  %2292 = vrcp.f32 %v415_v33  ;;  %v2289_v31 = vpop.eup %2288  ;;  %v438_v35 = vmul.f32 %v2287_v26, %v430_v25  ;;  %v1732_v26 = vld [vmem:[%s2812_s6 + $0x20] sm:$0xff] }
 0x198   :  { %2294 = vrcp.f32 %v418_v18  ;;  %v437_v40 = vmul.f32 %v2289_v31, %v429_v28 }
 0x199   :  { %2241 = vmatprep.subr.bf16.mxu0 %v2240_v8  ;;  %2268 = vmatprep.subr.bf16.mxu1 %v2240_v8  ;;  %2296 = vrcp.f32 %v417_v20  ;;  %v1728_v20 = vld [vmem:[%s2812_s6] sm:$0xff] }
 0x19a   :  { %2243 = vmatpush3.bf16.msra.mxu0 %v2240_v8  ;;  %2269 = vmatpush3.bf16.msra.mxu1 %v2240_v8  ;;  %2298 = vrcp.f32 %v419_v30  ;;  %v1735_v30 = vld [vmem:[%s2812_s6 + $0x38] sm:$0xff] }
 0x19b   :  { %2096 = vmatprep.subr.mxu1 %v2337_v41  ;;  %2106 = vmatprep.subr.mxu0 %v2337_v41  ;;  %v2254_v31 = vpack.c.bf16 %v1735_v30, %v1734_v29 }
 0x19d   :  { %2085 = vmatmul.mubr.msk.f32.vlgmr.msra.gmra.mrb[0].mxu0 %vm201_vm3, %v1936_v15  ;;  %2094 = vmatmul.mubr.msk.f32.vlgmr.msra.gmra.mrb[2].mxu1 %vm201_vm3, %v1942_v14 }
 0x19e   :  { %2087 = vmatprep.mubr.msk.f32.mxu0 %vm201_vm3, %v1937_v17  ;;  %2098 = vmatprep.mubr.msk.f32.mxu1 %vm2338_vm6, %v2337_v41 }
 0x1a0   :  { %v2291_v37 = vpop.eup %2290 }
 0x1a1   :  { %2088 = vmatmul.mubr.msk.f32.gmra.mrb[2].mxu0 %vm201_vm3, %v1938_v23  ;;  %v2293_v45 = vpop.eup %2292  ;;  %v440_v49 = vmul.f32 %v2291_v37, %v432_v36  ;;  %v2339_v23 = vmov 0.0|0.0   ;;  %v1738_v36 = vld [vmem:[%s2812_s6 + $0x50] sm:$0xff]  ;;  %v1739_v37 = vld [vmem:[%s2812_s6 + $0x58] sm:$0xff] }
 0x1a2   :  { %2090 = vmatprep.mubr.msk.f32.mxu0 %vm201_vm3, %v1939_v24  ;;  %v2295_v52 = vpop.eup %2294  ;;  %v439_v54 = vmul.f32 %v2293_v45, %v431_v42  ;;  %v2245_v24 = vpack.c.bf16 %v1729_v21, %v1728_v20 }
 0x1a3   :  { %2097 = vmatpush3.xpose.msk.msra.mxu1 %vm347_vm4, %v2482_v44  ;;  %2107 = vmatpush3.xpose.msk.msra.mxu0 %vm347_vm4, %v2489_v46  ;;  %v2297_v55 = vpop.eup %2296  ;;  %v442_v57 = vmul.f32 %v2295_v52, %v434_v50 }
 0x1a4   :  { %2101 = vmatprep.subr.mxu1 %v2337_v41  ;;  %2116 = vmatprep.subr.mxu0 %v2337_v41  ;;  %v2299_v61 = vpop.eup %2298 }
 0x1a5   :  { %2091 = vmatmul.mubr.msk.f32.gmra.mrb[4].mxu0 %vm201_vm3, %v1940_v34  ;;  %v443_v62 = vmul.f32 %v2299_v61, %v435_v59  ;;  %vm1636_vm3 = vcmask 57344   ;;  %v1737_v34 = vld [vmem:[%s2812_s6 + $0x48] sm:$0xff] }
 0x1a6   :  { %2099 = vmatmul.mubr.msk.f32.vlgmr.msra.gmra.mrb[4].mxu1 %vm347_vm4, %v436_v27  ;;  %2108 = vmatprep.mubr.msk.f32.mxu0 %vm2338_vm6, %v2337_v41  ;;  %v1643_v63 = vsel %vm1636_vm3, %v2503_v51, 0.0  ;;  %v1646_v0 = vsel %vm1636_vm3, %v2517_v58, 0.0  ;;  %v1733_v27 = vld [vmem:[%s2812_s6 + $0x28] sm:$0xff] }
 0x1a7   :  { %2102 = vmatpush3.xpose.msk.msra.mxu1 %vm347_vm4, %v2494_v48  ;;  %2103 = vmatprep.mubr.msk.f32.mxu1 %vm2338_vm6, %v2337_v41  ;;  %v433_v48 = vmul.f32 %v344_v47, %v2522_v60  ;;  %v2251_v28 = vpack.c.bf16 %v1733_v27, %v1732_v26 }
 0x1a8   :  { %2111 = vmatprep.subr.mxu1 %v2337_v41  ;;  %1644 = vadd.xlane.f32.xlu0 %v1643_v63 }
 0x1a9   :  { %2109 = vmatmul.mubr.msk.f32.vlgmr.msra.gmra.mrb[6].mxu0 %vm347_vm4, %v438_v35  ;;  %v2257_v35 = vpack.c.bf16 %v1737_v34, %v1736_v39 }
 0x1aa   :  { %2104 = vmatmul.mubr.msk.f32.vlgmr.msra.gmra.mrb[6].mxu1 %vm347_vm4, %v437_v40  ;;  %2117 = vmatpush3.xpose.msk.msra.mxu0 %vm347_vm4, %v2503_v51  ;;  %v2260_v40 = vpack.c.bf16 %v1739_v37, %v1738_v36 }
 0x1ab   :  { %2112 = vmatpush3.xpose.msk.msra.mxu1 %vm347_vm4, %v2508_v53  ;;  %2113 = vmatprep.mubr.msk.f32.mxu1 %vm2338_vm6, %v2337_v41  ;;  %v441_v53 = vmul.f32 %v2297_v55, %v433_v48 }
 0x1ac   :  { %2118 = vmatprep.mubr.msk.f32.mxu0 %vm2338_vm6, %v2337_v41  ;;  %2121 = vmatprep.subr.mxu1 %v2337_v41 }
 0x1ad   :  { %2119 = vmatmul.mubr.msk.f32.vlgmr.msra.gmra.mrb[8].mxu0 %vm347_vm4, %v440_v49  ;;  %2126 = vmatprep.subr.mxu0 %v2337_v41  ;;  %v1658_v49 = vshrl.u32 %v143_v38, 7  ;;  %v1740_v38 = vld [vmem:[%s2812_s6 + $0x60] sm:$0xff] }
 0x1ae   :  { %2114 = vmatmul.mubr.msk.f32.vlgmr.msra.gmra.mrb[8].mxu1 %vm347_vm4, %v439_v54  ;;  %2127 = vmatpush3.xpose.msk.msra.mxu0 %vm347_vm4, %v2517_v58 }
 0x1af   :  { %2122 = vmatpush3.xpose.msk.msra.mxu1 %vm347_vm4, %v2522_v60  ;;  %2123 = vmatprep.mubr.msk.f32.mxu1 %vm2338_vm6, %v2337_v41  ;;  %v1640_v60 = vsel %vm1636_vm3, %v2489_v46, 0.0  ;;  %v1659_v54 = vsub.s32 0, %v1658_v49 }
 0x1b0   :  { %2128 = vmatprep.mubr.msk.f32.mxu0 %vm2338_vm6, %v2337_v41  ;;  %2131 = vmatprep.subr.mxu1 %v2337_v41 }
 0x1b1   :  { %2129 = vmatmul.mubr.msk.f32.vlgmr.msra.gmra.mrb[10].mxu0 %vm347_vm4, %v442_v57  ;;  %2136 = vmatprep.subr.mxu0 %v2337_v41 }
 0x1b2   :  { %2124 = vmatmul.mubr.msk.f32.vlgmr.msra.gmra.mrb[10].mxu1 %vm347_vm4, %v441_v53  ;;  %2138 = vmatprep.mubr.msk.f32.mxu0 %vm2338_vm6, %v2337_v41 }
 0x1b3   :  { %2132 = vmatpush3.xpose.msk.msra.mxu1 %vm347_vm4, %v2533_v5  ;;  %2133 = vmatprep.mubr.msk.f32.mxu1 %vm2338_vm6, %v2337_v41  ;;  %v1637_v5 = vsel %vm1636_vm3, %v2482_v44, 0.0 }
 0x1b4   :  { %2141 = vmatprep.subr.mxu1 %v2337_v41  ;;  %1641 = vadd.xlane.f32.xlu1 %v1640_v60 }
 0x1b6   :  { %2134 = vmatmul.mubr.msk.f32.vlgmr.msra.gmra.mrb[12].mxu1 %vm347_vm4, %v443_v62 }
 0x1b7   :  { %2143 = vmatprep.mubr.msk.f32.mxu1 %vm2338_vm6, %v2337_v41 }
 0x1b8   :  { %1647 = vadd.xlane.f32.xlu1 %v1646_v0 }
 0x1bc   :  { %1638 = vadd.xlane.f32.xlu1 %v1637_v5 }
 0x235   :  { %v1645_v47 = vpop.xlane.xlu0 %1644 }
 0x241   :  { %v1642_v42 = vpop.xlane.xlu1 %1641 }
 0x245   :  { %v1648_v43 = vpop.xlane.xlu1 %1647 }
 0x249   :  { %v1639_v45 = vpop.xlane.xlu1 %1638 }
 0x24a   :  { %2300 = vrcp.f32 %v1639_v45 }
 0x24b   :  { %2302 = vrcp.f32 %v1642_v42 }
 0x24c   :  { %2304 = vrcp.f32 %v1645_v47 }
 0x24d   :  { %2306 = vrcp.f32 %v1648_v43 }
 0x254   :  { %v2301_v50 = vpop.eup %2300 }
 0x255   :  { %v1650_v52 = vmul.f32 0.5, %v2301_v50  ;;  %v2303_v48 = vpop.eup %2302 }
 0x256   :  { %v1652_v55 = vmul.f32 0.5, %v2303_v48  ;;  %v2305_v57 = vpop.eup %2304 }
 0x257   :  { %v1660_v56 = vrot.slane %v1650_v52, %v1659_v54  ;;  %v1654_v61 = vmul.f32 0.5, %v2305_v57  ;;  %v2307_v0 = vpop.eup %2306 }
 0x258   :  { %v1664_v63 = vrot.slane %v1652_v55, %v1659_v54 }
 0x270   :  { %v2663_v1 = vpop.f32.mrb[0].mxu0  ;;  %v2665_v3 = vpop.f32.mrb[2].mxu1 }
 0x271   :  { %v2667_v4 = vpop.f32.mrb[1].mxu0  ;;  %v2669_v6 = vpop.f32.mrb[3].mxu1  ;;  %2142 = vmatpush3.msra.mxu1 %v2663_v1  ;;  %v1688_v47 = vmul.f32 0.5, %v2665_v3 }
 0x272   :  { %2137 = vmatpush3.msra.mxu0 %v2667_v4  ;;  %2151 = vmatprep.subr.mxu1 %v2337_v41  ;;  %v1681_v59 = vmul.f32 0.5, %v2667_v4  ;;  %v1687_v30 = vmul.f32 0.5, %v2669_v6 }
 0x273   :  { %2146 = vmatprep.subr.mxu0 %v2337_v41 }
 0x274   :  { %v2675_v46 = vpop.f32.mrb[2].mxu0 }
 0x275   :  { %v2677_v44 = vpop.f32.mrb[3].mxu0 }
 0x278   :  { %v2679_v51 = vpop.f32.mrb[4].mxu0 }
 0x279   :  { %v2681_v58 = vpop.f32.mrb[5].mxu0  ;;  %v516_v7 = vpop.f32.mrb[4].mxu1 }
 0x27a   :  { %v2100_v8 = vpop.f32.mrb[5].mxu1  ;;  %2139 = vmatmul.mubr.msk.f32.vlgmr.msra.gmra.mrb[12].mxu0 %vm347_vm4, %v516_v7  ;;  %v1741_v7 = vld [vmem:[%s2812_s6 + $0x68] sm:$0xff] }
 0x27b   :  { %2147 = vmatpush3.msra.mxu0 %v2677_v44  ;;  %2148 = vmatprep.mubr.msk.f32.mxu0 %vm2338_vm6, %v2337_v41  ;;  %v1682_v8 = vmul.f32 0.5, %v2663_v1  ;;  %v1742_v1 = vld [vmem:[%s2812_s6 + $0x70] sm:$0xff] }
 0x27c   :  { %v668_v9 = vpop.f32.mrb[6].mxu0  ;;  %2156 = vmatprep.subr.mxu0 %v2337_v41 }
 0x27d   :  { %v592_v10 = vpop.f32.mrb[6].mxu1  ;;  %v2110_v11 = vpop.f32.mrb[7].mxu0 }
 0x27e   :  { %v2105_v32 = vpop.f32.mrb[7].mxu1  ;;  %2144 = vmatmul.mubr.msk.f32.vlgmr.msra.gmra.mrb[14].mxu1 %vm347_vm4, %v592_v10  ;;  %2149 = vmatmul.mubr.msk.f32.vlgmr.msra.gmra.mrb[14].mxu0 %vm347_vm4, %v668_v9  ;;  %v1683_v9 = vmul.f32 0.5, %v2677_v44  ;;  %v2263_v11 = vpack.c.bf16 %v1741_v7, %v1740_v38  ;;  %v1743_v44 = vld [vmem:[%s2812_s6 + $0x78] sm:$0xff] }
 0x27f   :  { %2152 = vmatpush3.msra.mxu1 %v2675_v46  ;;  %2157 = vmatpush3.msra.mxu0 %v2681_v58  ;;  %v1656_v32 = vmul.f32 0.5, %v2307_v0  ;;  %v2266_v21 = vpack.c.bf16 %v1743_v44, %v1742_v1 }
 0x280   :  { %v820_v33 = vpop.f32.mrb[8].mxu0  ;;  %2153 = vmatprep.mubr.msk.f32.mxu1 %vm2338_vm6, %v2337_v41  ;;  %2158 = vmatprep.mubr.msk.f32.mxu0 %vm2338_vm6, %v2337_v41 }
 0x281   :  { %v744_v12 = vpop.f32.mrb[8].mxu1  ;;  %2161 = vmatprep.subr.mxu1 %v2337_v41  ;;  %2166 = vmatprep.subr.mxu0 %v2337_v41  ;;  %v2120_v13 = vpop.f32.mrb[9].mxu0  ;;  %v1672_v26 = vrot.slane %v1656_v32, %v1659_v54 }
 0x282   :  { %v2115_v14 = vpop.f32.mrb[9].mxu1  ;;  %2154 = vmatmul.mubr.msk.f32.vlgmr.msra.gmra.mrb[16].mxu1 %vm347_vm4, %v744_v12  ;;  %2159 = vmatmul.mubr.msk.f32.vlgmr.msra.gmra.mrb[16].mxu0 %vm347_vm4, %v820_v33 }
 0x283   :  { %2162 = vmatpush3.msra.mxu1 %v2679_v51  ;;  %2167 = vmatpush3.msra.mxu0 %v2669_v6 }
 0x284   :  { %v972_v15 = vpop.f32.mrb[10].mxu0  ;;  %2163 = vmatprep.mubr.msk.f32.mxu1 %vm2338_vm6, %v2337_v41  ;;  %2168 = vmatprep.mubr.msk.f32.mxu0 %vm2338_vm6, %v2337_v41 }
 0x285   :  { %v896_v17 = vpop.f32.mrb[10].mxu1  ;;  %2171 = vmatprep.subr.mxu1 %v2337_v41  ;;  %v2130_v18 = vpop.f32.mrb[11].mxu0  ;;  %2244 = vmatprep.subr.bf16.mxu0 %v2339_v23 }
 0x286   :  { %v2125_v2 = vpop.f32.mrb[11].mxu1  ;;  %2164 = vmatmul.mubr.msk.f32.vlgmr.msra.gmra.mrb[18].mxu1 %vm347_vm4, %v896_v17  ;;  %2169 = vmatmul.mubr.msk.f32.vlgmr.msra.gmra.mrb[18].mxu0 %vm347_vm4, %v972_v15  ;;  %v1668_v15 = vrot.slane %v1654_v61, %v1659_v54  ;;  %v1975_v61 = vld [vmem:[%s2813_s7] ss:$0 sm:$0xff]  ;;  %s2343_s7 = smov [#allocation2]  }
 0x287   :  { %2172 = vmatpush3.msra.mxu1 %v2665_v3  ;;  %2173 = vmatprep.mubr.msk.f32.mxu1 %vm2338_vm6, %v2337_v41  ;;  %v1684_v2 = vmul.f32 0.5, %v2675_v46  ;;  %s1925_s0 = sshll.u32 %s2343_s7, 4  ;;  %s1926_s0 = int_to_ptr.vmem [resolvable:$true] %s1925_s0 }
 0x288   :  { %2208 = vmatprep.mubr.msk.f32.mxu0 %vm2338_vm6, %v2337_v41  ;;  %2211 = vmatprep.subr.mxu1 %v2337_v41  ;;  %s2312_s16 = scalar_lea.vmem %s1926_s0, 32  ;;  %p2317_p1 = scmp.lt.s32.totalorder %s1926_s0, %s1926_s0 }
 0x289   :  { %v1048_v19 = vpop.f32.mrb[12].mxu1  ;;  %2246 = vmatpush3.bf16.msra.mxu0 %v2245_v24  ;;  %p2313_p0 = scmp.ne.s32.totalorder %s1926_s0, %s2312_s16  ;;  %p2318_p2 = scmp.lt.s32.totalorder %s2312_s16, %s2312_s16 }
 0x28a   :  { %v2135_v16 = vpop.f32.mrb[13].mxu1  ;;  %2174 = vmatmul.mubr.msk.f32.vlgmr.msra.gmra.mrb[20].mxu1 %vm347_vm4, %v1048_v19  ;;  %2247 = vmatprep.subr.bf16.mxu0 %v2339_v23  ;;  %v1685_v19 = vmul.f32 0.5, %v2681_v58  ;;  %vm1700_vm4 = vcmask 1041409   ;;  %v1686_v58 = vmul.f32 0.5, %v2679_v51 }
 0x28b   :  { %2213 = vmatprep.mubr.msk.f32.mxu1 %vm2338_vm6, %v2337_v41  ;;  %v1731_v41 = vld [vmem:[%s2812_s6 + $0x18] sm:$0xff]  ;;  %s2340_s6 = smov 32   ;;  %p2319_p3 = por %p2318_p2, %p2317_p1 }
 0x28c   :  { %v2248_v25 = vpack.c.bf16 %v1731_v41, %v1730_v22 }
 0x28d   :  { %p2320_p4 = pnand %p2319_p3, %p2313_p0 }
 0x28e   :  { %2249 = vmatpush3.bf16.msra.mxu0 %v2248_v25 }
 0x28f   :  { %2250 = vmatprep.subr.bf16.mxu0 %v2339_v23 }
 0x292   :  { %2252 = vmatpush3.bf16.msra.mxu0 %v2251_v28 }
 0x293   :  { %2253 = vmatprep.subr.bf16.mxu0 %v2339_v23 }
 0x296   :  { %2255 = vmatpush3.bf16.msra.mxu0 %v2254_v31 }
 0x297   :  { %2256 = vmatprep.subr.bf16.mxu0 %v2339_v23 }
 0x29a   :  { %2258 = vmatpush3.bf16.msra.mxu0 %v2257_v35 }
 0x29b   :  { %2259 = vmatprep.subr.bf16.mxu0 %v2339_v23 }
 0x29e   :  { %2261 = vmatpush3.bf16.msra.mxu0 %v2260_v40 }
 0x29f   :  { %2262 = vmatprep.subr.bf16.mxu0 %v2339_v23 }
 0x2a2   :  { %2264 = vmatpush3.bf16.msra.mxu0 %v2263_v11 }
 0x2a3   :  { %2265 = vmatprep.subr.bf16.mxu0 %v2339_v23 }
 0x2a6   :  { %2267 = vmatpush3.bf16.msra.mxu0 %v2266_v21 }
 0x34d   :  { %v1121_v53 = vpop.f32.mrb[12].mxu0 }
 0x34e   :  { %v1673_v62 = vmul.f32 %v1660_v56, %v1121_v53  ;;  %v2140_v60 = vpop.f32.mrb[13].mxu0 }
 0x350   :  { %v1689_v5 = vadd.f32 %v1681_v59, %v1673_v62 }
 0x351   :  { %v1194_v10 = vpop.f32.mrb[14].mxu1  ;;  %v1267_v4 = vpop.f32.mrb[14].mxu0 }
 0x352   :  { %v1674_v33 = vmul.f32 %v1660_v56, %v1194_v10  ;;  %v1675_v12 = vmul.f32 %v1664_v63, %v1267_v4  ;;  %v2145_v13 = vpop.f32.mrb[15].mxu1  ;;  %v2150_v14 = vpop.f32.mrb[15].mxu0 }
 0x354   :  { %v1690_v17 = vadd.f32 %v1682_v8, %v1674_v33  ;;  %v1691_v18 = vadd.f32 %v1683_v9, %v1675_v12 }
 0x355   :  { %v1340_v16 = vpop.f32.mrb[16].mxu1  ;;  %v1413_v20 = vpop.f32.mrb[16].mxu0 }
 0x356   :  { %v1699_v22 = vrot.slane %v1690_v17, 7  ;;  %v1676_v24 = vmul.f32 %v1664_v63, %v1340_v16  ;;  %v1677_v41 = vmul.f32 %v1668_v15, %v1413_v20  ;;  %v2155_v23 = vpop.f32.mrb[17].mxu1  ;;  %v2160_v25 = vpop.f32.mrb[17].mxu0 }
 0x358   :  { %v1692_v27 = vadd.f32 %v1684_v2, %v1676_v24  ;;  %v1693_v28 = vadd.f32 %v1685_v19, %v1677_v41  ;;  %v1701_v29 = vsel %vm1700_vm4, %v1699_v22, %v1689_v5 }
 0x359   :  { %v1486_v46 = vpop.f32.mrb[18].mxu1  ;;  %v1559_v31 = vpop.f32.mrb[18].mxu0 }
 0x35a   :  { %v1705_v39 = vrot.slane %v1692_v27, 7  ;;  %v1678_v34 = vmul.f32 %v1668_v15, %v1486_v46  ;;  %v1679_v35 = vmul.f32 %v1672_v26, %v1559_v31  ;;  %v2165_v36 = vpop.f32.mrb[19].mxu1  ;;  %v2170_v37 = vpop.f32.mrb[19].mxu0 }
 0x35c   :  { %v1694_v40 = vadd.f32 %v1686_v58, %v1678_v34  ;;  %v1695_v42 = vadd.f32 %v1687_v30, %v1679_v35  ;;  %v1706_v43 = vsel %vm1700_vm4, %v1705_v39, %v1691_v18 }
 0x35d   :  { %v1632_v45 = vpop.f32.mrb[20].mxu1  ;;  %1707 = vrot.lane.b32.xlu1 %v1706_v43, %s2340_s6 }
 0x35e   :  { %v1712_v49 = vrot.slane %v1694_v40, 7  ;;  %v1680_v6 = vmul.f32 %v1672_v26, %v1632_v45  ;;  %v2175_v50 = vpop.f32.mrb[21].mxu1 }
 0x360   :  { %v1696_v52 = vadd.f32 %v1688_v47, %v1680_v6  ;;  %v1713_v51 = vsel %vm1700_vm4, %v1712_v49, %v1693_v28 }
 0x361   :  { %1714 = vrot.lane.b32.xlu0 %v1713_v51, %s2341_s1 }
 0x362   :  { %v1719_v54 = vrot.slane %v1696_v52, 7 }
 0x364   :  { %v1720_v48 = vsel %vm1700_vm4, %v1719_v54, %v1695_v42 }
 0x365   :  { %1721 = vrot.lane.b32.xlu1 %v1720_v48, %s2342_s13 }
 0x3cf   :  { %v1708_v55 = vpop.permute.xlu1 %1707 }
 0x3d0   :  { %v1724_v57 = vsel %vm130_vm1, %v1701_v29, %v1708_v55 }
 0x3d3   :  { %v1715_v56 = vpop.permute.xlu0 %1714 }
 0x3d4   :  { %v1726_v53 = vsel %vm1725_vm9, %v1724_v57, %v1715_v56 }
 0x3d7   :  { %v1722_v3 = vpop.permute.xlu1 %1721 }
 0x3d8   :  { %v1727_v59 = vsel %vm46_vm0, %v1726_v53, %v1722_v3  ;;  %vm1917_vm0 = vcmask 9216  }
 0x3d9   :  { %2209 = vmatmul.mubr.f32.vlgmr.msra.gmra.mrb[20].mxu0 %v1727_v59 }
 0x4ac   :  { %v1817_v62 = vpop.f32.mrb[20].mxu0 }
 0x4ad   :  { %v1818_v60 = vadd.f32 %v1975_v61, %v1817_v62  ;;  %v2210_v63 = vpop.f32.mrb[21].mxu0 }
 0x4af   :  { %v1821_v0 = vmul.f32 %v1818_v60, %v1818_v60 }
 0x4b1   :  { %1830 = vrot.lane.b32.xlu1 %v1821_v0, %s2342_s13  ;;  %v1823_v5 = vsel %vm1822_vm10, %v1821_v0, 0.0 }
 0x4b2   :  { %1824 = vadd.xlane.f32.xlu0 %v1823_v5 }
 0x523   :  { %v1831_v38 = vpop.permute.xlu1 %1830 }
 0x524   :  { %v1833_v7 = vsel %vm1822_vm10, %v1831_v38, 0.0 }
 0x525   :  { %1834 = vadd.xlane.f32.xlu1 %v1833_v7 }
 0x53f   :  { %v1825_v11 = vpop.xlane.xlu0 %1824 }
 0x540   :  { %v1826_v32 = vmax.f32 %v1825_v11, 1e-24 }
 0x5b2   :  { %v1835_v8 = vpop.xlane.xlu1 %1834 }
 0x5b3   :  { %v1836_v9 = vmax.f32 %v1835_v8, 1e-24 }
 0x5b5   :  { %2308 = vrsqrt.f32 %v1836_v9 }
 0x5b6   :  { %2310 = vrsqrt.f32 %v1826_v32 }
 0x5bf   :  { %v2309_v10 = vpop.eup %2308 }
 0x5c0   :  { %v1838_v4 = vmul.f32 %v2309_v10, %v1818_v60  ;;  %v2311_v33 = vpop.eup %2310 }
 0x5c1   :  { %v1828_v13 = vmul.f32 %v2311_v33, %v1818_v60 }
 0x5c2   :  { %1840 = vrot.lane.b32.xlu1 %v1838_v4, %s2342_s13 }
 0x634   :  { %v1841_v12 = vpop.permute.xlu1 %1840 }
 0x635   :  { %2212 = vmatpush3.xpose.msk.msra.mxu1 %vm130_vm1, %v1841_v12 }
 0x638   :  { %2214 = vmatmul.mubr.msk.f32.vlgmr.msra.gmra.mrb[22].mxu1 %vm130_vm1, %v1828_v13 }
 0x70b   :  { %v1913_v14 = vpop.f32.mrb[22].mxu1 }
 0x70c   :  { %1918 = vst.msk [vmem:[#allocation2] sm:$0x3] %vm1917_vm0, %v1913_v14  ;;  %v2215_v15 = vpop.f32.mrb[23].mxu1 }
 0x70d   :  { %2323 = shalt.err (!%p2320_p4)
}
 0x70e   :  { %s2324_s4 = scalar_lea.hbm %s2814_s8, 32 }
 0x70f   :  { %p2325_p5 = scmp.ne.s32.totalorder %s2814_s8, %s2324_s4  ;;  %p2328_p6 = scmp.lt.u32.totalorder %s2324_s4, %s2814_s8 }
 0x711   :  { %p2330_p7 = pnand %p2328_p6, %p2325_p5 }
 0x713   :  { %2333 = shalt.err (!%p2330_p7)
}
 0x714   :  { %1928 = dma.vmem_to_hbm [thread:$0]  %s1926_s0, 32, %s2814_s8, [#allocation3]  }
 0x715   :  { %2334 = dma.done.wait [#allocation3], 32  }
 0x716   :  { %2335 = vsyncadd [#allocation3], 4294967264 }
 0x717   :  { %1932 = vsyncpa [#allocation3], 1 }

</bundles_post_ra>
